<compile_context>
chip_gen: v7x
topology: tpu7x:2x2x1
jax: 0.10.0
libtpu: 0.0.40
codegen_flags: <defaults>
</compile_context>

<pallas_src>
import numpy as np
import jax
import jax.numpy as jnp
from jax import lax
from jax.experimental import pallas as pl
from jax.experimental.pallas import tpu as pltpu


_STRIDE = 4      # feature-map stride of the surrogate encoder
_LATENT = 16     # surrogate latent dim
_HIDDEN = 32     # surrogate MLP hidden dim


def _round_up(x, m):
    return ((x + m - 1) // m) * m


# ----------------------------------------------------------------------------
# Kernel 1: fused bilinear resize (align_corners=True), single pallas_call.
#   Per grid step a chunk of frames is resized as Ah @ frame @ AwT with Ah/AwT
#   grid-invariant VMEM blocks; the (Ho, F*W) intermediate never touches HBM.
# ----------------------------------------------------------------------------
def _interp_matrix(n_in, n_out):
    """Row-stochastic bilinear interpolation matrix (n_out, n_in), align_corners=True."""
    A = np.zeros((n_out, n_in), np.float32)
    if n_out == 1 or n_in == 1:
        A[:, 0] = 1.0
        return jnp.asarray(A)
    src = np.arange(n_out, dtype=np.float64) * (n_in - 1) / (n_out - 1)
    j0 = np.clip(np.floor(src).astype(np.int64), 0, n_in - 2)
    w = (src - j0).astype(np.float32)
    A[np.arange(n_out), j0] = 1.0 - w
    A[np.arange(n_out), j0 + 1] = w
    return jnp.asarray(A)


def pallas_resize(frames, ah, awt, *, frames_per_block=8):
    """frames: (F, H, W) f32 -> (F, Ho, Wo) f32, bilinear, align_corners=True."""
    F_, H, W = frames.shape
    Ho, Wo = ah.shape[0], awt.shape[1]
    fb = min(frames_per_block, F_)
    Fp = _round_up(F_, fb)
    if Fp != F_:
        frames = jnp.pad(frames, ((0, Fp - F_), (0, 0), (0, 0)))
    batched_first = (H % 8 == 0)   # sublane-aligned merge of (fb, H) rows

    def kernel(x_ref, ah_ref, awt_ref, o_ref):
        ah_v = ah_ref[...]
        awt_v = awt_ref[...]
        if batched_first:
            z = jnp.dot(x_ref[...].reshape(fb * H, W), awt_v,
                        preferred_element_type=jnp.float32)          # (fb*H, Wo)
            for f in range(fb):
                o_ref[f] = jnp.dot(ah_v, z[f * H:(f + 1) * H, :],
                                   preferred_element_type=jnp.float32)
        else:
            for f in range(fb):
                zf = jnp.dot(x_ref[f], awt_v, preferred_element_type=jnp.float32)
                o_ref[f] = jnp.dot(ah_v, zf, preferred_element_type=jnp.float32)

    flops = 2 * Fp * (H * W * Wo + Ho * H * Wo)
    bytes_accessed = 4 * (Fp * H * W + Ho * H + W * Wo + Fp * Ho * Wo)
    out = pl.pallas_call(
        kernel,
        out_shape=jax.ShapeDtypeStruct((Fp, Ho, Wo), jnp.float32),
        grid=(Fp // fb,),
        in_specs=[
            pl.BlockSpec((fb, H, W), lambda i: (i, 0, 0)),
            pl.BlockSpec((Ho, H), lambda i: (0, 0)),
            pl.BlockSpec((W, Wo), lambda i: (0, 0)),
        ],
        out_specs=pl.BlockSpec((fb, Ho, Wo), lambda i: (i, 0, 0)),
        compiler_params=pltpu.CompilerParams(dimension_semantics=("parallel",)),
        cost_estimate=pl.CostEstimate(flops=int(flops), transcendentals=0,
                                      bytes_accessed=int(bytes_accessed)),
    )(frames, ah, awt)
    return out[:F_]


# ----------------------------------------------------------------------------
# Kernel 2: fused 1x1 projection + ReLU + 4x4 average pool.
#   pooled = relu(xwin @ Wblock + b) @ P  (pre-pool features never hit HBM).
#   Inputs/weights in bf16, f32 accumulation, bf16 feature output.
# ----------------------------------------------------------------------------
def pallas_project_pool(xwin, w_block, b_block, pool_mat, *, tm=1024,
                        out_dtype=jnp.bfloat16):
    M, K = xwin.shape                 # K = 16*3 packed pixels of one pooling window
    Kb, Npre = w_block.shape          # (48, 16*D) block-diagonal projection
    assert K == Kb
    D = pool_mat.shape[1]
    # Keep the (tm, 16*D) f32 pre-pool intermediate bounded (VMEM on v7x).
    tm_cap = max(8, min(tm, (4 << 20) // max(Npre * 4, 1)))
    tm_eff = min(tm_cap, _round_up(M, 8))
    Mp = _round_up(M, tm_eff)
    if Mp != M:
        xwin = jnp.pad(xwin, ((0, Mp - M), (0, 0)))

    def kernel(x_ref, w_ref, b_ref, p_ref, o_ref):
        h = jnp.dot(x_ref[...], w_ref[...], preferred_element_type=jnp.float32)
        h = jnp.maximum(h + b_ref[...], 0.0)
        o_ref[...] = jnp.dot(h, p_ref[...],
                             preferred_element_type=jnp.float32).astype(out_dtype)

    flops = 2 * Mp * (K * Npre + Npre * D)
    bytes_accessed = (Mp * K * xwin.dtype.itemsize + K * Npre * w_block.dtype.itemsize
                      + 4 * Npre * (1 + D) + Mp * D * jnp.dtype(out_dtype).itemsize)
    out = pl.pallas_call(
        kernel,
        out_shape=jax.ShapeDtypeStruct((Mp, D), out_dtype),
        grid=(Mp // tm_eff,),
        in_specs=[
            pl.BlockSpec((tm_eff, K), lambda i: (i, 0)),
            pl.BlockSpec((K, Npre), lambda i: (0, 0)),
            pl.BlockSpec((1, Npre), lambda i: (0, 0)),
            pl.BlockSpec((Npre, D), lambda i: (0, 0)),
        ],
        out_specs=pl.BlockSpec((tm_eff, D), lambda i: (i, 0)),
        compiler_params=pltpu.CompilerParams(dimension_semantics=("parallel",)),
        cost_estimate=pl.CostEstimate(flops=int(flops), transcendentals=0,
                                      bytes_accessed=int(bytes_accessed)),
    )(xwin, w_block, b_block, pool_mat)
    return out[:M]


# ----------------------------------------------------------------------------
# Kernel 3: query-frame feature sampling in Pallas.
#   One-hot (N, T*HW) bf16 matmul against the whole (T*HW, D) feature map per
#   batch -- no take_along_axis duplication of fmap in HBM.
# ----------------------------------------------------------------------------
def pallas_query_features(fmap, queries, *, hf, wf, stride=_STRIDE):
    B, T, HW, D = fmap.shape
    assert HW == hf * wf
    N = queries.shape[1]
    inv_s = 1.0 / float(stride)

    def kernel(fm_ref, q_ref, o_ref):
        fm = fm_ref[...].reshape(T * HW, D)          # bf16; HW % 8 == 0 -> free merge
        q = q_ref[...].reshape(N, 3)
        tq = jnp.clip(q[:, 0:1], 0.0, float(T - 1))
        cx = jnp.clip(q[:, 1:2] * inv_s, 0.0, wf - 1.0)
        cy = jnp.clip(q[:, 2:3] * inv_s, 0.0, hf - 1.0)
        x0 = jnp.clip(jnp.floor(cx), 0.0, wf - 2.0)
        y0 = jnp.clip(jnp.floor(cy), 0.0, hf - 2.0)
        wx = cx - x0
        wy = cy - y0
        col = lax.broadcasted_iota(jnp.int32, (N, T * HW), 1)
        base = (tq.astype(jnp.int32) * HW + y0.astype(jnp.int32) * wf
                + x0.astype(jnp.int32))
        d = col - base                               # int32 indexing (no float ==)
        smat = ((d == 0).astype(jnp.float32) * ((1.0 - wx) * (1.0 - wy))
                + (d == 1).astype(jnp.float32) * (wx * (1.0 - wy))
                + (d == wf).astype(jnp.float32) * ((1.0 - wx) * wy)
                + (d == wf + 1).astype(jnp.float32) * (wx * wy))
        qf = jnp.dot(smat.astype(fm.dtype), fm, preferred_element_type=jnp.float32)
        o_ref[...] = qf.reshape(1, N, D)

    flops = 2 * B * N * T * HW * D
    bytes_accessed = (B * T * HW * D * fmap.dtype.itemsize + 4 * B * N * (3 + D))
    return pl.pallas_call(
        kernel,
        out_shape=jax.ShapeDtypeStruct((B, N, D), jnp.float32),
        grid=(B,),
        in_specs=[
            pl.BlockSpec((1, T, HW, D), lambda b: (b, 0, 0, 0)),
            pl.BlockSpec((1, N, 3), lambda b: (b, 0, 0)),
        ],
        out_specs=pl.BlockSpec((1, N, D), lambda b: (b, 0, 0)),
        compiler_params=pltpu.CompilerParams(dimension_semantics=("parallel",)),
        cost_estimate=pl.CostEstimate(flops=int(flops), transcendentals=0,
                                      bytes_accessed=int(bytes_accessed)),
    )(fmap, queries)


# ----------------------------------------------------------------------------
# Kernel 4: batched 6-iteration track refinement.
#   grid=(B, nsplit); each block holds Tb=T/nsplit frames of the feature map and
#   iterates over a stacked (Tb*N, .) state.  Bilinear sample = block-diagonal
#   one-hot (Tb*N, Tb*HW) bf16 matmul; MLP matmuls are (Tb*N, D)/(Tb*N, hidden).
#   Output is one lane-4 block per step: (tx, ty, vis_logit, pad).
# ----------------------------------------------------------------------------
def pallas_refine(fmap, qxy, qfeat, w1s, w1q, w1r, b1, w2, b2, *,
                  hf, wf, iters, nsplit, stride=_STRIDE):
    B, T, HW, D = fmap.shape
    assert T % nsplit == 0
    N = qxy.shape[1]
    hidden = w1s.shape[1]
    no = w2.shape[1]
    Tb = T // nsplit
    TbN = Tb * N
    TbHW = Tb * HW
    inv_s = 1.0 / float(stride)
    b1_2 = jnp.asarray(b1, jnp.float32).reshape(1, hidden)
    b2_2 = jnp.asarray(b2, jnp.float32).reshape(1, no)

    def kernel(fm_ref, qxy_ref, qf_ref, w1s_ref, w1q_ref, w1r_ref, b1_ref,
               w2_ref, b2_ref, o_ref):
        fm = fm_ref[...].reshape(TbHW, D)                       # bf16
        qxy_v = qxy_ref[...].reshape(N, 2)
        qf_v = qf_ref[...].reshape(N, D)
        # Tile queries across the Tb frames of this block.
        qxy_t = jnp.concatenate([qxy_v] * Tb, axis=0)           # (TbN, 2)
        qf_t = jnp.concatenate([qf_v] * Tb, axis=0)             # (TbN, D)
        w1s_v = w1s_ref[...]
        w1r0 = w1r_ref[0:1, :]
        w1r1 = w1r_ref[1:2, :]
        w2_v = w2_ref[...]
        b2_v = b2_ref[...]
        # Iteration-invariant query-feature contribution (hoisted out of the loop).
        qcon = jnp.dot(qf_t, w1q_ref[...], preferred_element_type=jnp.float32) + b1_ref[...]
        col = lax.broadcasted_iota(jnp.int32, (TbN, TbHW), 1)
        rowoff = jnp.concatenate(
            [jnp.full((N, 1), t * HW, jnp.int32) for t in range(Tb)], axis=0)

        # TODO(synk): at real CoTracker feature-map sizes (HW in the thousands)
        #             switch this full one-hot to a windowed one-hot / SMEM-indexed
        #             DMA gather to bound the O(TbN*TbHW) mask work.
        def body(_, carry):
            tr, vl = carry
            cx = jnp.clip(tr[:, 0:1] * inv_s, 0.0, wf - 1.0)
            cy = jnp.clip(tr[:, 1:2] * inv_s, 0.0, hf - 1.0)
            x0 = jnp.clip(jnp.floor(cx), 0.0, wf - 2.0)
            y0 = jnp.clip(jnp.floor(cy), 0.0, hf - 2.0)
            wx = cx - x0
            wy = cy - y0
            base = rowoff + y0.astype(jnp.int32) * wf + x0.astype(jnp.int32)
            d = col - base
            smat = ((d == 0).astype(jnp.float32) * ((1.0 - wx) * (1.0 - wy))
                    + (d == 1).astype(jnp.float32) * (wx * (1.0 - wy))
                    + (d == wf).astype(jnp.float32) * ((1.0 - wx) * wy)
                    + (d == wf + 1).astype(jnp.float32) * (wx * wy))     # (TbN, TbHW)
            samp = jnp.dot(smat.astype(fm.dtype), fm,
                           preferred_element_type=jnp.float32)           # (TbN, D)
            rel = tr - qxy_t
            h = (jnp.dot(samp, w1s_v, preferred_element_type=jnp.float32)
                 + rel[:, 0:1] * w1r0 + rel[:, 1:2] * w1r1 + qcon)
            h = jnp.maximum(h, 0.0)
            delta = jnp.dot(h, w2_v, preferred_element_type=jnp.float32) + b2_v
            return tr + delta[:, 0:2], vl + delta[:, 2:3]

        tr0 = qxy_t
        vl0 = jnp.zeros((TbN, 1), jnp.float32)
        tr_f, vl_f = lax.fori_loop(0, iters, body, (tr0, vl0), unroll=2)
        out = jnp.concatenate(
            [tr_f, vl_f, jnp.zeros((TbN, 1), jnp.float32)], axis=1)      # (TbN, 4)
        o_ref[...] = out.reshape(1, 1, TbN, 4)

    flops = B * nsplit * (iters * 2 * TbN * (TbHW * D + D * hidden + hidden * no)
                          + 2 * TbN * D * hidden)
    bytes_accessed = (B * T * HW * D * fmap.dtype.itemsize
                      + 4 * B * N * (2 + D)
                      + 4 * (2 * D * hidden + 2 * hidden + hidden * no + no)
                      + 4 * B * T * N * 4)
    out4 = pl.pallas_call(
        kernel,
        out_shape=jax.ShapeDtypeStruct((B, nsplit, TbN, 4), jnp.float32),
        grid=(B, nsplit),
        in_specs=[
            pl.BlockSpec((1, Tb, HW, D), lambda b, s: (b, s, 0, 0)),
            pl.BlockSpec((1, N, 2), lambda b, s: (b, 0, 0)),
            pl.BlockSpec((1, N, D), lambda b, s: (b, 0, 0)),
            pl.BlockSpec((D, hidden), lambda b, s: (0, 0)),
            pl.BlockSpec((D, hidden), lambda b, s: (0, 0)),
            pl.BlockSpec((2, hidden), lambda b, s: (0, 0)),
            pl.BlockSpec((1, hidden), lambda b, s: (0, 0)),
            pl.BlockSpec((hidden, no), lambda b, s: (0, 0)),
            pl.BlockSpec((1, no), lambda b, s: (0, 0)),
        ],
        out_specs=pl.BlockSpec((1, 1, TbN, 4), lambda b, s: (b, s, 0, 0)),
        compiler_params=pltpu.CompilerParams(
            dimension_semantics=("parallel", "parallel")),
        cost_estimate=pl.CostEstimate(flops=int(flops), transcendentals=0,
                                      bytes_accessed=int(bytes_accessed)),
    )(fmap, qxy, qfeat, w1s, w1q, w1r, b1_2, w2, b2_2)
    return out4


# ----------------------------------------------------------------------------
# Synthetic CoTracker core model parameters (deterministic surrogate).
# TODO(synk): the real CoTracker2 CNN encoder + transformer updater is a full
#             checkpointed network; here it is a deterministic surrogate with
#             the same (video, queries, iters) -> (tracks, vis) interface.
# ----------------------------------------------------------------------------
def _init_model_params(latent_dim=_LATENT, hidden=_HIDDEN):
    k = jax.random.PRNGKey(42)
    k1, k2, k3 = jax.random.split(k, 3)
    in_dim = 2 * latent_dim + 2
    return {
        "w_proj": 0.5 * jax.random.normal(k1, (3, latent_dim), jnp.float32),
        "b_proj": jnp.zeros((latent_dim,), jnp.float32),
        "w1": 0.1 * jax.random.normal(k2, (in_dim, hidden), jnp.float32),
        "b1": jnp.zeros((hidden,), jnp.float32),
        "w2": 0.05 * jax.random.normal(k3, (hidden, 3), jnp.float32),
        "b2": jnp.zeros((3,), jnp.float32),
    }


def get_points_on_a_grid(size, extent):
    """Mirrors cotracker get_points_on_a_grid (default center, shift_grid=False)."""
    He, We = float(extent[0]), float(extent[1])
    if size == 1:
        return jnp.array([[[We / 2.0, He / 2.0]]], jnp.float32)
    margin = We / 64.0
    gy = jnp.linspace(margin, He - margin, size)
    gx = jnp.linspace(margin, We - margin, size)
    grid_y, grid_x = jnp.meshgrid(gy, gx, indexing="ij")
    return jnp.stack([grid_x, grid_y], axis=-1).reshape(1, -1, 2).astype(jnp.float32)


# ----------------------------------------------------------------------------
# Predictor (mirrors CoTrackerPredictor._compute_sparse_tracks, queries path)
# ----------------------------------------------------------------------------
class CoTrackerPredictorPallas:
    def __init__(self, interp_shape=(24, 32), support_grid_size=6):
        self.interp_shape = interp_shape
        self.support_grid_size = support_grid_size
        self.params = _init_model_params()
        D = self.params["w_proj"].shape[1]
        npix = _STRIDE * _STRIDE
        # Encoder constants precomputed once (kron/tile/eye hoisted out of the call).
        # bf16 projection weights are a deliberate tolerance choice for the surrogate.
        self.w_block = jnp.kron(jnp.eye(npix, dtype=jnp.float32),
                                self.params["w_proj"]).astype(jnp.bfloat16)
        self.b_block = jnp.tile(self.params["b_proj"], npix).reshape(1, npix * D)
        self.pool_mat = jnp.tile(jnp.eye(D, dtype=jnp.float32), (npix, 1)) / float(npix)
        # Refinement MLP weight splits.
        w1 = self.params["w1"]
        self.w1s = w1[:D]
        self.w1q = w1[D:2 * D]
        self._w1r_raw = w1[2 * D:2 * D + 2]
        self._interp_mats = {}
        # TODO(synk): dense-track loop, segm_mask masking and backward_tracking
        #             branches are not exercised here (queries path only).

    def _get_interp(self, n_in, n_out):
        key = (n_in, n_out)
        if key not in self._interp_mats:
            self._interp_mats[key] = _interp_matrix(n_in, n_out)
        return self._interp_mats[key]

    def __call__(self, video, queries, grid_query_frame=0):
        B, T, C, H, W = video.shape
        assert C == 3
        Hi, Wi = self.interp_shape
        assert Hi % _STRIDE == 0 and Wi % _STRIDE == 0
        Hf, Wf = Hi // _STRIDE, Wi // _STRIDE
        HW = Hf * Wf
        D = self.params["w_proj"].shape[1]
        npix = _STRIDE * _STRIDE

        # 1) fused bilinear resize of every (frame, channel) plane, single Pallas pass.
        ah = self._get_interp(H, Hi)
        awt = self._get_interp(W, Wi).T
        frames = video.reshape(B * T * C, H, W).astype(jnp.float32)
        frames_r = pallas_resize(frames, ah, awt)                        # (B*T*3, Hi, Wi)

        # 2) rescale query xy into interpolated resolution.
        q = queries.astype(jnp.float32)
        scale = jnp.array([(Wi - 1) / (W - 1), (Hi - 1) / (H - 1)], jnp.float32)
        q = q.at[:, :, 1:].multiply(scale)

        # 3) add 6x6 support grid (grid_size == 0 -> add_support_grid=True).
        gp = get_points_on_a_grid(self.support_grid_size, (Hi, Wi))      # (1, 36, 2)
        gp = jnp.concatenate([jnp.zeros_like(gp[:, :, :1]), gp], axis=2)
        gp = jnp.broadcast_to(gp, (B, gp.shape[1], 3))
        q_all = jnp.concatenate([q, gp], axis=1)                         # (B, N, 3)
        N = q_all.shape[1]

        # 4a) window packing for the fused projection+pool kernel.
        # TODO(synk): at real resolutions fold this repack into the encoder kernel's
        #             DMA/index_map instead of an extra HBM transpose pass.
        v = frames_r.reshape(B, T, C, Hf, _STRIDE, Wf, _STRIDE)
        v = jnp.transpose(v, (0, 1, 3, 5, 4, 6, 2))                      # (B,T,Hf,Wf,4,4,3)
        xwin = v.reshape(B * T * HW, npix * C).astype(jnp.bfloat16)

        # 4b) fused 1x1 projection + ReLU + 4x4 average pool -> bf16 feature map.
        fmap = pallas_project_pool(xwin, self.w_block, self.b_block, self.pool_mat)
        fmap = fmap.reshape(B, T, HW, D)                                 # bf16

        # 4c) query features at the query frame (one-hot sample in Pallas).
        qfeat = pallas_query_features(fmap, q_all, hf=Hf, wf=Wf)         # (B, N, D) f32

        # 4d) batched 6-iteration refinement; >=2 parallel grid steps for v7x dual-TC.
        nsplit = 2 if (T % 2 == 0 and T >= 2) else 1
        inv_extent = jnp.array([[1.0 / Wi], [1.0 / Hi]], jnp.float32)
        w1r = self._w1r_raw * inv_extent      # fold rel-coord normalization into weights
        out4 = pallas_refine(fmap, q_all[:, :, 1:3], qfeat,
                             self.w1s, self.w1q, w1r,
                             self.params["b1"], self.params["w2"], self.params["b2"],
                             hf=Hf, wf=Wf, iters=6, nsplit=nsplit)
        out4 = out4.reshape(B, T, N, 4)
        tracks = out4[..., 0:2]
        vis = jax.nn.sigmoid(out4[..., 2])

        # 5) strip support grid, threshold, write query coords at query frames, rescale.
        S = self.support_grid_size ** 2
        tracks = tracks[:, :, :-S]
        vis = vis[:, :, :-S]
        vis = vis > 0.9

        nr = tracks.shape[2]
        bidx = jnp.arange(B)[:, None]
        ar = jnp.arange(nr)[None, :]
        qt = q_all[:, :nr, 0].astype(jnp.int32)
        tracks = tracks.at[bidx, qt, ar].set(q_all[:, :nr, 1:])
        vis = vis.at[bidx, qt, ar].set(True)

        inv_scale = jnp.array([(W - 1) / (Wi - 1), (H - 1) / (Hi - 1)], jnp.float32)
        tracks = tracks * inv_scale
        return tracks, vis


# ----------------------------------------------------------------------------
if __name__ == "__main__":
    key = jax.random.PRNGKey(0)
    B, T, C, H, W = 2, 8, 3, 16, 16
    kv, kt, kx, ky = jax.random.split(key, 4)
    video = jax.random.uniform(kv, (B, T, C, H, W), jnp.float32)

    # queries: (B, Nq, 3) = (frame, x, y) in ORIGINAL video resolution.
    Nq = 4
    tq = jax.random.randint(kt, (B, Nq), 0, T).astype(jnp.float32)
    qx = jax.random.uniform(kx, (B, Nq), minval=0.0, maxval=float(W - 1))
    qy = jax.random.uniform(ky, (B, Nq), minval=0.0, maxval=float(H - 1))
    queries = jnp.stack([tq, qx, qy], axis=-1)

    predictor = CoTrackerPredictorPallas()
    tracks, vis = predictor(video, queries)
    tracks, vis = jax.block_until_ready((tracks, vis))

    # sanity: fused Pallas resize matches the dense einsum reference.
    frames = video.reshape(B * T * C, H, W)
    ah = _interp_matrix(H, predictor.interp_shape[0])
    awt = _interp_matrix(W, predictor.interp_shape[1]).T
    ref = jnp.einsum("oh,fhw,wv->fov", ah, frames, awt)
    got = pallas_resize(frames, ah, awt)
    assert float(jnp.max(jnp.abs(got - ref))) < 1e-3, "resize mismatch"

    assert tracks.shape == (B, T, Nq, 2), tracks.shape
    assert vis.shape == (B, T, Nq) and vis.dtype == jnp.bool_, (vis.shape, vis.dtype)
    assert bool(jnp.all(jnp.isfinite(tracks)))
    print("KERNEL_OK")
</pallas_src>

<mosaic_0001>
module attributes {stable_mosaic.version = 11 : i64} {
  func.func @kernel(%arg0: i32, %arg1: memref<8x16x16xf32, #tpu.memory_space<vmem>>, %arg2: memref<24x16xf32, #tpu.memory_space<vmem>>, %arg3: memref<16x32xf32, #tpu.memory_space<vmem>>, %arg4: memref<8x24x32xf32, #tpu.memory_space<vmem>>) attributes {dimension_semantics = [#tpu.dimension_semantics<parallel>], iteration_bounds = array<i64: 6>, scalar_prefetch = 0 : i64, scratch_operands = 0 : i64, tpu.core_type = #tpu.core_type<tc>, window_params = [{transform_indices = @transform_0, window_bounds = array<i64: 8, 16, 16>}, {pipeline_mode = #tpu.pipeline_mode<synchronous>, transform_indices = @transform_1, window_bounds = array<i64: 24, 16>}, {pipeline_mode = #tpu.pipeline_mode<synchronous>, transform_indices = @transform_2, window_bounds = array<i64: 16, 32>}, {transform_indices = @transform_3, window_bounds = array<i64: 8, 24, 32>}]} {
    %c0 = arith.constant 0 : index
    %c0_0 = arith.constant 0 : index
    %0 = vector.load %arg2[%c0, %c0_0] : memref<24x16xf32, #tpu.memory_space<vmem>>, vector<24x16xf32>
    %c0_1 = arith.constant 0 : index
    %c0_2 = arith.constant 0 : index
    %1 = vector.load %arg3[%c0_1, %c0_2] : memref<16x32xf32, #tpu.memory_space<vmem>>, vector<16x32xf32>
    %c0_3 = arith.constant 0 : index
    %c0_4 = arith.constant 0 : index
    %c0_5 = arith.constant 0 : index
    %2 = vector.load %arg1[%c0_3, %c0_4, %c0_5] : memref<8x16x16xf32, #tpu.memory_space<vmem>>, vector<8x16x16xf32>
    %3 = vector.shape_cast %2 : vector<8x16x16xf32> to vector<128x16xf32>
    %cst = arith.constant dense<0.000000e+00> : vector<128x32xf32>
    %4 = tpu.matmul %3, %1, %cst {dimension_numbers = #tpu.dot_dimension_numbers<[1], [0], [0], [1], [0, 0, 1, 1], [], []>} : vector<128x16xf32>, vector<16x32xf32>, vector<128x32xf32> -> vector<128x32xf32>
    %5 = vector.extract_strided_slice %4 {offsets = [0, 0], sizes = [16, 32], strides = [1, 1]} : vector<128x32xf32> to vector<16x32xf32>
    %cst_6 = arith.constant dense<0.000000e+00> : vector<24x32xf32>
    %6 = tpu.matmul %0, %5, %cst_6 {dimension_numbers = #tpu.dot_dimension_numbers<[1], [0], [0], [1], [0, 0, 1, 1], [], []>} : vector<24x16xf32>, vector<16x32xf32>, vector<24x32xf32> -> vector<24x32xf32>
    %c0_7 = arith.constant 0 : index
    %c0_8 = arith.constant 0 : index
    %c0_9 = arith.constant 0 : index
    %7 = vector.load %arg4[%c0_7, %c0_8, %c0_9] : memref<8x24x32xf32, #tpu.memory_space<vmem>>, vector<1x24x32xf32>
    %8 = vector.shape_cast %7 : vector<1x24x32xf32> to vector<24x32xf32>
    %9 = vector.shape_cast %6 : vector<24x32xf32> to vector<1x24x32xf32>
    tpu.vector_store %arg4[%c0_7, %c0_8, %c0_9], %9 {strides = array<i32>} : memref<8x24x32xf32, #tpu.memory_space<vmem>>, vector<1x24x32xf32>,
    %10 = vector.extract_strided_slice %4 {offsets = [16, 0], sizes = [16, 32], strides = [1, 1]} : vector<128x32xf32> to vector<16x32xf32>
    %cst_10 = arith.constant dense<0.000000e+00> : vector<24x32xf32>
    %11 = tpu.matmul %0, %10, %cst_10 {dimension_numbers = #tpu.dot_dimension_numbers<[1], [0], [0], [1], [0, 0, 1, 1], [], []>} : vector<24x16xf32>, vector<16x32xf32>, vector<24x32xf32> -> vector<24x32xf32>
    %c1 = arith.constant 1 : index
    %c0_11 = arith.constant 0 : index
    %c0_12 = arith.constant 0 : index
    %12 = vector.load %arg4[%c1, %c0_11, %c0_12] : memref<8x24x32xf32, #tpu.memory_space<vmem>>, vector<1x24x32xf32>
    %13 = vector.shape_cast %12 : vector<1x24x32xf32> to vector<24x32xf32>
    %14 = vector.shape_cast %11 : vector<24x32xf32> to vector<1x24x32xf32>
    tpu.vector_store %arg4[%c1, %c0_11, %c0_12], %14 {strides = array<i32>} : memref<8x24x32xf32, #tpu.memory_space<vmem>>, vector<1x24x32xf32>,
    %15 = vector.extract_strided_slice %4 {offsets = [32, 0], sizes = [16, 32], strides = [1, 1]} : vector<128x32xf32> to vector<16x32xf32>
    %cst_13 = arith.constant dense<0.000000e+00> : vector<24x32xf32>
    %16 = tpu.matmul %0, %15, %cst_13 {dimension_numbers = #tpu.dot_dimension_numbers<[1], [0], [0], [1], [0, 0, 1, 1], [], []>} : vector<24x16xf32>, vector<16x32xf32>, vector<24x32xf32> -> vector<24x32xf32>
    %c2 = arith.constant 2 : index
    %c0_14 = arith.constant 0 : index
    %c0_15 = arith.constant 0 : index
    %17 = vector.load %arg4[%c2, %c0_14, %c0_15] : memref<8x24x32xf32, #tpu.memory_space<vmem>>, vector<1x24x32xf32>
    %18 = vector.shape_cast %17 : vector<1x24x32xf32> to vector<24x32xf32>
    %19 = vector.shape_cast %16 : vector<24x32xf32> to vector<1x24x32xf32>
    tpu.vector_store %arg4[%c2, %c0_14, %c0_15], %19 {strides = array<i32>} : memref<8x24x32xf32, #tpu.memory_space<vmem>>, vector<1x24x32xf32>,
    %20 = vector.extract_strided_slice %4 {offsets = [48, 0], sizes = [16, 32], strides = [1, 1]} : vector<128x32xf32> to vector<16x32xf32>
    %cst_16 = arith.constant dense<0.000000e+00> : vector<24x32xf32>
    %21 = tpu.matmul %0, %20, %cst_16 {dimension_numbers = #tpu.dot_dimension_numbers<[1], [0], [0], [1], [0, 0, 1, 1], [], []>} : vector<24x16xf32>, vector<16x32xf32>, vector<24x32xf32> -> vector<24x32xf32>
    %c3 = arith.constant 3 : index
    %c0_17 = arith.constant 0 : index
    %c0_18 = arith.constant 0 : index
    %22 = vector.load %arg4[%c3, %c0_17, %c0_18] : memref<8x24x32xf32, #tpu.memory_space<vmem>>, vector<1x24x32xf32>
    %23 = vector.shape_cast %22 : vector<1x24x32xf32> to vector<24x32xf32>
    %24 = vector.shape_cast %21 : vector<24x32xf32> to vector<1x24x32xf32>
    tpu.vector_store %arg4[%c3, %c0_17, %c0_18], %24 {strides = array<i32>} : memref<8x24x32xf32, #tpu.memory_space<vmem>>, vector<1x24x32xf32>,
    %25 = vector.extract_strided_slice %4 {offsets = [64, 0], sizes = [16, 32], strides = [1, 1]} : vector<128x32xf32> to vector<16x32xf32>
    %cst_19 = arith.constant dense<0.000000e+00> : vector<24x32xf32>
    %26 = tpu.matmul %0, %25, %cst_19 {dimension_numbers = #tpu.dot_dimension_numbers<[1], [0], [0], [1], [0, 0, 1, 1], [], []>} : vector<24x16xf32>, vector<16x32xf32>, vector<24x32xf32> -> vector<24x32xf32>
    %c4 = arith.constant 4 : index
    %c0_20 = arith.constant 0 : index
    %c0_21 = arith.constant 0 : index
    %27 = vector.load %arg4[%c4, %c0_20, %c0_21] : memref<8x24x32xf32, #tpu.memory_space<vmem>>, vector<1x24x32xf32>
    %28 = vector.shape_cast %27 : vector<1x24x32xf32> to vector<24x32xf32>
    %29 = vector.shape_cast %26 : vector<24x32xf32> to vector<1x24x32xf32>
    tpu.vector_store %arg4[%c4, %c0_20, %c0_21], %29 {strides = array<i32>} : memref<8x24x32xf32, #tpu.memory_space<vmem>>, vector<1x24x32xf32>,
    %30 = vector.extract_strided_slice %4 {offsets = [80, 0], sizes = [16, 32], strides = [1, 1]} : vector<128x32xf32> to vector<16x32xf32>
    %cst_22 = arith.constant dense<0.000000e+00> : vector<24x32xf32>
    %31 = tpu.matmul %0, %30, %cst_22 {dimension_numbers = #tpu.dot_dimension_numbers<[1], [0], [0], [1], [0, 0, 1, 1], [], []>} : vector<24x16xf32>, vector<16x32xf32>, vector<24x32xf32> -> vector<24x32xf32>
    %c5 = arith.constant 5 : index
    %c0_23 = arith.constant 0 : index
    %c0_24 = arith.constant 0 : index
    %32 = vector.load %arg4[%c5, %c0_23, %c0_24] : memref<8x24x32xf32, #tpu.memory_space<vmem>>, vector<1x24x32xf32>
    %33 = vector.shape_cast %32 : vector<1x24x32xf32> to vector<24x32xf32>
    %34 = vector.shape_cast %31 : vector<24x32xf32> to vector<1x24x32xf32>
    tpu.vector_store %arg4[%c5, %c0_23, %c0_24], %34 {strides = array<i32>} : memref<8x24x32xf32, #tpu.memory_space<vmem>>, vector<1x24x32xf32>,
    %35 = vector.extract_strided_slice %4 {offsets = [96, 0], sizes = [16, 32], strides = [1, 1]} : vector<128x32xf32> to vector<16x32xf32>
    %cst_25 = arith.constant dense<0.000000e+00> : vector<24x32xf32>
    %36 = tpu.matmul %0, %35, %cst_25 {dimension_numbers = #tpu.dot_dimension_numbers<[1], [0], [0], [1], [0, 0, 1, 1], [], []>} : vector<24x16xf32>, vector<16x32xf32>, vector<24x32xf32> -> vector<24x32xf32>
    %c6 = arith.constant 6 : index
    %c0_26 = arith.constant 0 : index
    %c0_27 = arith.constant 0 : index
    %37 = vector.load %arg4[%c6, %c0_26, %c0_27] : memref<8x24x32xf32, #tpu.memory_space<vmem>>, vector<1x24x32xf32>
    %38 = vector.shape_cast %37 : vector<1x24x32xf32> to vector<24x32xf32>
    %39 = vector.shape_cast %36 : vector<24x32xf32> to vector<1x24x32xf32>
    tpu.vector_store %arg4[%c6, %c0_26, %c0_27], %39 {strides = array<i32>} : memref<8x24x32xf32, #tpu.memory_space<vmem>>, vector<1x24x32xf32>,
    %40 = vector.extract_strided_slice %4 {offsets = [112, 0], sizes = [16, 32], strides = [1, 1]} : vector<128x32xf32> to vector<16x32xf32>
    %cst_28 = arith.constant dense<0.000000e+00> : vector<24x32xf32>
    %41 = tpu.matmul %0, %40, %cst_28 {dimension_numbers = #tpu.dot_dimension_numbers<[1], [0], [0], [1], [0, 0, 1, 1], [], []>} : vector<24x16xf32>, vector<16x32xf32>, vector<24x32xf32> -> vector<24x32xf32>
    %c7 = arith.constant 7 : index
    %c0_29 = arith.constant 0 : index
    %c0_30 = arith.constant 0 : index
    %42 = vector.load %arg4[%c7, %c0_29, %c0_30] : memref<8x24x32xf32, #tpu.memory_space<vmem>>, vector<1x24x32xf32>
    %43 = vector.shape_cast %42 : vector<1x24x32xf32> to vector<24x32xf32>
    %44 = vector.shape_cast %41 : vector<24x32xf32> to vector<1x24x32xf32>
    tpu.vector_store %arg4[%c7, %c0_29, %c0_30], %44 {strides = array<i32>} : memref<8x24x32xf32, #tpu.memory_space<vmem>>, vector<1x24x32xf32>,
    return
  }
  func.func @transform_0(%arg0: i32) -> (i32, i32, i32) {
    %c0_i32 = arith.constant 0 : i32
    %c0_i32_0 = arith.constant 0 : i32
    %c0_i32_1 = arith.constant 0 : i32
    return %arg0, %c0_i32, %c0_i32_0 : i32, i32, i32
  }
  func.func @transform_1(%arg0: i32) -> (i32, i32) {
    %c0_i32 = arith.constant 0 : i32
    %c0_i32_0 = arith.constant 0 : i32
    %c0_i32_1 = arith.constant 0 : i32
    return %c0_i32, %c0_i32_0 : i32, i32
  }
  func.func @transform_2(%arg0: i32) -> (i32, i32) {
    %c0_i32 = arith.constant 0 : i32
    %c0_i32_0 = arith.constant 0 : i32
    %c0_i32_1 = arith.constant 0 : i32
    return %c0_i32, %c0_i32_0 : i32, i32
  }
  func.func @transform_3(%arg0: i32) -> (i32, i32, i32) {
    %c0_i32 = arith.constant 0 : i32
    %c0_i32_0 = arith.constant 0 : i32
    %c0_i32_1 = arith.constant 0 : i32
    return %arg0, %c0_i32, %c0_i32_0 : i32, i32, i32
  }
}

</mosaic_0001>

<bundles_post_ra>
// kernel: tpu_custom_call.1
= control target key start
LH: loop header
LB: loop body
LE: loop exit
PB: predicated region body
PF: predicated region fallthrough
CT: control target
= control target key end

     0   :  { %s1470_s12 = smov 0   ;;  %s1700_s0 = inlined_call_operand.vmem [shape: f32[48,16,16], index: 0, kind: input, shape index: {}]   ;;  %s1701_s1 = inlined_call_operand.vmem [shape: f32[24,16], index: 1, kind: input, shape index: {}]   ;;  %s1702_s2 = inlined_call_operand.vmem [shape: f32[16,32], index: 2, kind: input, shape index: {}]   ;;  %s1703_s3 = inlined_call_operand.vmem [shape: f32[48,24,32], index: 3, kind: output, shape index: {}]  }
   0x1 LB: > { %s1133_s13 = sadd.s32 4294967295, %s1445_s12   ;;  %p1137_p0 = scmp.ge.s32.totalorder %s1445_s12, 1  ;;  %s1445_s12 = sphi %s1470_s12, %s13_s12  }
   0x2   : > { %p139_p1 = scmp.lt.s32.totalorder %s1445_s12, 7 }
   0x4   : > { %p140_p2 = pnand %p1137_p0, %p139_p1 }
   0x5   : > { %v182_v0 = vld [vmem:[%s1702_s2] sm:$0xff] (!%p140_p2)  ;;  %v183_v1 = vld [vmem:[%s1702_s2 + $0x8] sm:$0xff] (!%p140_p2)  ;;  %s1138_s18 = sshll.u32 (!%p140_p2), %s1133_s13, 3  ;;  %vm200_vm0 = vcmask (!%p140_p2), 130048   ;;  %v1447_v19 = vmov (!%p140_p2), 0.0|0.0   ;;  %vm1448_vm1 = vmmov (!%p140_p2), 0  }
   0x6   : > { %143 = sbr.rel (%p140_p2) target bundleno = 505 (0x1f9), region = 32  ;;  %v1397_v2 = vpack.c.bf16 (!%p140_p2), %v183_v1, %v182_v0  ;;  %p166_p3 = scmp.lt.s32.totalorder (!%p140_p2), %s1138_s18, 47  ;;  %v1449_v20 = vmov (!%p140_p2), 0.0   ;;  %v1533_v25 = vld [vmem:[%s1701_s1] sm:$0xff] (!%p140_p2)  ;;  %v1543_v32 = vld [vmem:[%s1701_s1 + $0x8] sm:$0xff] (!%p140_p2)  ;;  %v1553_v36 = vld [vmem:[%s1701_s1 + $0x10] sm:$0xff] (!%p140_p2) }
   0x7   : > { %vm483_vm2 = vcmask (!%p140_p2), 261120  }
   0x8   : > { %1398 = vmatprep.subr.bf16.mxu0 (!%p140_p2), %v1397_v2  ;;  %1425 = vmatprep.subr.bf16.mxu1 (!%p140_p2), %v1397_v2 }
   0x9   : > { %1400 = vmatpush3.bf16.msra.mxu0 (!%p140_p2), %v1397_v2  ;;  %1426 = vmatpush3.bf16.msra.mxu1 (!%p140_p2), %v1397_v2 }
   0xa   : > { %1401 = vmatprep.subr.bf16.mxu1 (!%p140_p2), %v1447_v19  ;;  %1410 = vmatprep.subr.bf16.mxu0 (!%p140_p2), %v1447_v19 }
   0xd   : > { %s1705_s18 = smov (!%p166_p3, %s1138_s18), 47 }
   0xe   : > { %s1206_s19 = sshll.u32 %s1705_s18, 4  ;;  %s1427_s29 = smul.u32 24, %s1705_s18 }
   0xf   : > { %s1490_s22 = scalar_lea.vmem %s1700_s0, %s1206_s19 }
  0x10   : > { %v184_v3 = vld [vmem:[%s1490_s22] sm:$0xff]  ;;  %v185_v4 = vld [vmem:[%s1490_s22 + $0x8] sm:$0xff]  ;;  %v186_v5 = vld [vmem:[%s1490_s22 + $0x10] sm:$0xff]  ;;  %s1647_s5 = scalar_lea.vmem %s1703_s3, %s1427_s29 }
  0x11   : > { %1269 = vmatprep.mubr.msk.f32.mxu0 %vm200_vm0, %v184_v3  ;;  %v187_v6 = vld [vmem:[%s1490_s22 + $0x18] sm:$0xff]  ;;  %v188_v7 = vld [vmem:[%s1490_s22 + $0x20] sm:$0xff]  ;;  %v198_v8 = vld [vmem:[%s1490_s22 + $0x70] sm:$0xff] }
  0x12   : > { %1270 = vmatmul.mubr.msk.f32.vlgmr.msra.gmra.mrb[0].mxu0 %vm200_vm0, %v185_v4  ;;  %1290 = vmatprep.mubr.msk.f32.mxu1 %vm200_vm0, %v198_v8  ;;  %v199_v9 = vld [vmem:[%s1490_s22 + $0x78] sm:$0xff]  ;;  %v189_v10 = vld [vmem:[%s1490_s22 + $0x28] sm:$0xff]  ;;  %v190_v11 = vld [vmem:[%s1490_s22 + $0x30] sm:$0xff] }
  0x13   : > { %1272 = vmatprep.mubr.msk.f32.mxu0 %vm200_vm0, %v186_v5  ;;  %1291 = vmatmul.mubr.msk.f32.vlgmr.msra.gmra.mrb[0].mxu1 %vm200_vm0, %v199_v9  ;;  %v191_v12 = vld [vmem:[%s1490_s22 + $0x38] sm:$0xff]  ;;  %v192_v13 = vld [vmem:[%s1490_s22 + $0x40] sm:$0xff]  ;;  %v193_v14 = vld [vmem:[%s1490_s22 + $0x48] sm:$0xff] }
  0x14   : > { %v194_v15 = vld [vmem:[%s1490_s22 + $0x50] sm:$0xff]  ;;  %v195_v16 = vld [vmem:[%s1490_s22 + $0x58] sm:$0xff]  ;;  %v196_v17 = vld [vmem:[%s1490_s22 + $0x60] sm:$0xff]  ;;  %1297 = vmatprep.mubr.msk.f32.mxu1 %vm1448_vm1, %v1449_v20 }
  0x15   : > { %v197_v18 = vld [vmem:[%s1490_s22 + $0x68] sm:$0xff] }
  0x16   : > { %1273 = vmatmul.mubr.msk.f32.gmra.mrb[2].mxu0 %vm200_vm0, %v187_v6 }
  0x17   : > { %1275 = vmatprep.mubr.msk.f32.mxu0 %vm200_vm0, %v188_v7 }
  0x1a   : > { %1276 = vmatmul.mubr.msk.f32.gmra.mrb[4].mxu0 %vm200_vm0, %v189_v10 }
  0x1b   : > { %1278 = vmatprep.mubr.msk.f32.mxu0 %vm200_vm0, %v190_v11 }
  0x1e   : > { %1279 = vmatmul.mubr.msk.f32.gmra.mrb[6].mxu0 %vm200_vm0, %v191_v12 }
  0x1f   : > { %1281 = vmatprep.mubr.msk.f32.mxu0 %vm200_vm0, %v192_v13 }
  0x22   : > { %1282 = vmatmul.mubr.msk.f32.gmra.mrb[8].mxu0 %vm200_vm0, %v193_v14 }
  0x23   : > { %1284 = vmatprep.mubr.msk.f32.mxu0 %vm200_vm0, %v194_v15 }
  0x26   : > { %1285 = vmatmul.mubr.msk.f32.gmra.mrb[10].mxu0 %vm200_vm0, %v195_v16 }
  0x27   : > { %1287 = vmatprep.mubr.msk.f32.mxu0 %vm200_vm0, %v196_v17 }
  0x2a   : > { %1288 = vmatmul.mubr.msk.f32.gmra.mrb[12].mxu0 %vm200_vm0, %v197_v18 }
  0x2b   : > { %1336 = vmatprep.mubr.msk.f32.mxu0 %vm1448_vm1, %v1449_v20 }
  0xe5   : > { %v1271_v21 = vpop.f32.mrb[0].mxu0 }
  0xe6   : > { %v315_v22 = vpop.f32.mrb[1].mxu0  ;;  %v1292_v26 = vpop.f32.mrb[0].mxu1 }
  0xe7   : > { %v1402_v23 = vpack.c.bf16 %v1271_v21, %v315_v22  ;;  %v385_v28 = vpop.f32.mrb[1].mxu1 }
  0xe8   : > { %v1423_v30 = vpack.c.bf16 %v1292_v26, %v385_v28 }
  0xe9   : > { %v1274_v24 = vpop.f32.mrb[2].mxu0  ;;  %1403 = vmatpush3.bf16.msra.mxu1 %v1402_v23 }
  0xea   : > { %v325_v27 = vpop.f32.mrb[3].mxu0  ;;  %1404 = vmatprep.subr.bf16.mxu1 %v1447_v19 }
  0xeb   : > { %v1405_v29 = vpack.c.bf16 %v1274_v24, %v325_v27 }
  0xec   : > { %1298 = vmatmul.mubr.msk.f32.vlgmr.msra.gmra.mrb[2].mxu1 %vm200_vm0, %v1533_v25 }
  0xed   : > { %v1277_v31 = vpop.f32.mrb[4].mxu0  ;;  %1406 = vmatpush3.bf16.msra.mxu1 %v1405_v29  ;;  %1300 = vmatprep.mubr.msk.f32.mxu1 %vm1448_vm1, %v1449_v20 }
  0xee   : > { %v335_v33 = vpop.f32.mrb[5].mxu0  ;;  %1407 = vmatprep.subr.bf16.mxu1 %v1447_v19 }
  0xef   : > { %v1408_v34 = vpack.c.bf16 %v1277_v31, %v335_v33 }
  0xf0   : > { %1301 = vmatmul.mubr.msk.f32.gmra.mrb[4].mxu1 %vm200_vm0, %v1543_v32 }
  0xf1   : > { %v1280_v35 = vpop.f32.mrb[6].mxu0  ;;  %1303 = vmatprep.mubr.msk.f32.mxu1 %vm1448_vm1, %v1449_v20 }
  0xf2   : > { %v345_v37 = vpop.f32.mrb[7].mxu0 }
  0xf3   : > { %v1411_v38 = vpack.c.bf16 %v1280_v35, %v345_v37 }
  0xf4   : > { %1304 = vmatmul.mubr.msk.f32.gmra.mrb[6].mxu1 %vm200_vm0, %v1553_v36 }
  0xf5   : > { %1412 = vmatpush3.bf16.msra.mxu0 %v1411_v38  ;;  %1310 = vmatprep.mubr.msk.f32.mxu1 %vm1448_vm1, %v1449_v20  ;;  %v1283_v39 = vpop.f32.mrb[8].mxu0 }
  0xf6   : > { %v355_v40 = vpop.f32.mrb[9].mxu0  ;;  %1416 = vmatprep.subr.bf16.mxu0 %v1447_v19 }
  0xf7   : > { %v1414_v41 = vpack.c.bf16 %v1283_v39, %v355_v40 }
  0xf8   : > { %1311 = vmatmul.mubr.msk.f32.vlgmr.msra.gmra.mrb[8].mxu1 %vm200_vm0, %v1533_v25  ;;  %1337 = vmatmul.mubr.msk.f32.vlgmr.msra.gmra.mrb[14].mxu0 %vm200_vm0, %v1533_v25 }
  0xf9   : > { %1409 = vmatpush3.bf16.msra.mxu1 %v1408_v34  ;;  %1313 = vmatprep.mubr.msk.f32.mxu1 %vm1448_vm1, %v1449_v20  ;;  %v1286_v42 = vpop.f32.mrb[10].mxu0 }
  0xfa   : > { %1413 = vmatprep.subr.bf16.mxu1 %v1447_v19  ;;  %v365_v43 = vpop.f32.mrb[11].mxu0  ;;  %1339 = vmatprep.mubr.msk.f32.mxu0 %vm1448_vm1, %v1449_v20 }
  0xfb   : > { %v1417_v44 = vpack.c.bf16 %v1286_v42, %v365_v43 }
  0xfc   : > { %1314 = vmatmul.mubr.msk.f32.gmra.mrb[10].mxu1 %vm200_vm0, %v1543_v32  ;;  %1340 = vmatmul.mubr.msk.f32.gmra.mrb[16].mxu0 %vm200_vm0, %v1543_v32 }
  0xfd   : > { %1316 = vmatprep.mubr.msk.f32.mxu1 %vm1448_vm1, %v1449_v20  ;;  %1418 = vmatpush3.bf16.msra.mxu0 %v1417_v44  ;;  %v1289_v45 = vpop.f32.mrb[12].mxu0 }
  0xfe   : > { %1342 = vmatprep.mubr.msk.f32.mxu0 %vm1448_vm1, %v1449_v20  ;;  %v375_v46 = vpop.f32.mrb[13].mxu0  ;;  %1422 = vmatprep.subr.bf16.mxu0 %v1447_v19 }
  0xff   : > { %v1420_v47 = vpack.c.bf16 %v1289_v45, %v375_v46 }
 0x100   : > { %1317 = vmatmul.mubr.msk.f32.gmra.mrb[12].mxu1 %vm200_vm0, %v1553_v36  ;;  %1343 = vmatmul.mubr.msk.f32.gmra.mrb[18].mxu0 %vm200_vm0, %v1553_v36 }
 0x101   : > { %1323 = vmatprep.mubr.msk.f32.mxu1 %vm1448_vm1, %v1449_v20  ;;  %1362 = vmatprep.mubr.msk.f32.mxu0 %vm1448_vm1, %v1449_v20 }
 0x104   : > { %1324 = vmatmul.mubr.msk.f32.vlgmr.msra.gmra.mrb[14].mxu1 %vm200_vm0, %v1533_v25  ;;  %1363 = vmatmul.mubr.msk.f32.vlgmr.msra.gmra.mrb[20].mxu0 %vm200_vm0, %v1533_v25 }
 0x105   : > { %1415 = vmatpush3.bf16.msra.mxu1 %v1414_v41  ;;  %1326 = vmatprep.mubr.msk.f32.mxu1 %vm1448_vm1, %v1449_v20 }
 0x106   : > { %1419 = vmatprep.subr.bf16.mxu1 %v1447_v19  ;;  %1424 = vmatpush3.bf16.msra.mxu0 %v1423_v30 }
 0x107   : > { %1365 = vmatprep.mubr.msk.f32.mxu0 %vm1448_vm1, %v1449_v20 }
 0x108   : > { %1327 = vmatmul.mubr.msk.f32.gmra.mrb[16].mxu1 %vm200_vm0, %v1543_v32  ;;  %1366 = vmatmul.mubr.msk.f32.gmra.mrb[22].mxu0 %vm200_vm0, %v1543_v32 }
 0x109   : > { %1329 = vmatprep.mubr.msk.f32.mxu1 %vm1448_vm1, %v1449_v20  ;;  %1368 = vmatprep.mubr.msk.f32.mxu0 %vm1448_vm1, %v1449_v20 }
 0x10c   : > { %1330 = vmatmul.mubr.msk.f32.gmra.mrb[18].mxu1 %vm200_vm0, %v1553_v36  ;;  %1369 = vmatmul.mubr.msk.f32.gmra.mrb[24].mxu0 %vm200_vm0, %v1553_v36 }
 0x10d   : > { %1349 = vmatprep.mubr.msk.f32.mxu1 %vm1448_vm1, %v1449_v20  ;;  %1388 = vmatprep.mubr.msk.f32.mxu0 %vm1448_vm1, %v1449_v20 }
 0x110   : > { %1350 = vmatmul.mubr.msk.f32.vlgmr.msra.gmra.mrb[20].mxu1 %vm200_vm0, %v1533_v25  ;;  %1389 = vmatmul.mubr.msk.f32.vlgmr.msra.gmra.mrb[26].mxu0 %vm200_vm0, %v1533_v25 }
 0x111   : > { %1421 = vmatpush3.bf16.msra.mxu1 %v1420_v47  ;;  %1352 = vmatprep.mubr.msk.f32.mxu1 %vm1448_vm1, %v1449_v20 }
 0x112   : > { %1391 = vmatprep.mubr.msk.f32.mxu0 %vm1448_vm1, %v1449_v20 }
 0x114   : > { %1353 = vmatmul.mubr.msk.f32.gmra.mrb[22].mxu1 %vm200_vm0, %v1543_v32  ;;  %1392 = vmatmul.mubr.msk.f32.gmra.mrb[28].mxu0 %vm200_vm0, %v1543_v32 }
 0x115   : > { %1355 = vmatprep.mubr.msk.f32.mxu1 %vm1448_vm1, %v1449_v20  ;;  %1394 = vmatprep.mubr.msk.f32.mxu0 %vm1448_vm1, %v1449_v20 }
 0x118   : > { %1356 = vmatmul.mubr.msk.f32.gmra.mrb[24].mxu1 %vm200_vm0, %v1553_v36  ;;  %1395 = vmatmul.mubr.msk.f32.gmra.mrb[30].mxu0 %vm200_vm0, %v1553_v36 }
 0x119   : > { %1375 = vmatprep.mubr.msk.f32.mxu1 %vm1448_vm1, %v1449_v20 }
 0x11c   : > { %1376 = vmatmul.mubr.msk.f32.vlgmr.msra.gmra.mrb[26].mxu1 %vm200_vm0, %v1533_v25 }
 0x11d   : > { %1378 = vmatprep.mubr.msk.f32.mxu1 %vm1448_vm1, %v1449_v20 }
 0x120   : > { %1379 = vmatmul.mubr.msk.f32.gmra.mrb[28].mxu1 %vm200_vm0, %v1543_v32 }
 0x121   : > { %1381 = vmatprep.mubr.msk.f32.mxu1 %vm1448_vm1, %v1449_v20 }
 0x124   : > { %1382 = vmatmul.mubr.msk.f32.gmra.mrb[30].mxu1 %vm200_vm0, %v1553_v36 }
 0x1bf   : > { %v469_v48 = vpop.f32.mrb[2].mxu1 }
 0x1c0   : > { %484 = vst.msk [vmem:[%s1647_s5] sm:$0xff] %vm483_vm2, %v469_v48  ;;  %v1299_v49 = vpop.f32.mrb[3].mxu1 }
 0x1c3   : > { %v474_v50 = vpop.f32.mrb[4].mxu1 }
 0x1c4   : > { %485 = vst.msk [vmem:[%s1647_s5 + $0x8] sm:$0xff] %vm483_vm2, %v474_v50  ;;  %v1302_v51 = vpop.f32.mrb[5].mxu1 }
 0x1c7   : > { %v479_v52 = vpop.f32.mrb[6].mxu1 }
 0x1c8   : > { %486 = vst.msk [vmem:[%s1647_s5 + $0x10] sm:$0xff] %vm483_vm2, %v479_v52  ;;  %v1305_v53 = vpop.f32.mrb[7].mxu1 }
 0x1cb   : > { %v553_v54 = vpop.f32.mrb[8].mxu1  ;;  %v721_v55 = vpop.f32.mrb[14].mxu0 }
 0x1cc   : > { %1165 = vst.msk [vmem:[%s1647_s5 + $0x18] sm:$0xff] %vm483_vm2, %v553_v54  ;;  %v1312_v56 = vpop.f32.mrb[9].mxu1  ;;  %1177 = vst.msk [vmem:[%s1647_s5 + $0x48] sm:$0xff] %vm483_vm2, %v721_v55  ;;  %v1338_v57 = vpop.f32.mrb[15].mxu0 }
 0x1cf   : > { %v558_v58 = vpop.f32.mrb[10].mxu1  ;;  %v726_v59 = vpop.f32.mrb[16].mxu0 }
 0x1d0   : > { %1166 = vst.msk [vmem:[%s1647_s5 + $0x20] sm:$0xff] %vm483_vm2, %v558_v58  ;;  %v1315_v60 = vpop.f32.mrb[11].mxu1  ;;  %1178 = vst.msk [vmem:[%s1647_s5 + $0x50] sm:$0xff] %vm483_vm2, %v726_v59  ;;  %v1341_v61 = vpop.f32.mrb[17].mxu0 }
 0x1d3   : > { %v563_v62 = vpop.f32.mrb[12].mxu1  ;;  %v731_v63 = vpop.f32.mrb[18].mxu0 }
 0x1d4   : > { %1167 = vst.msk [vmem:[%s1647_s5 + $0x28] sm:$0xff] %vm483_vm2, %v563_v62  ;;  %v1318_v0 = vpop.f32.mrb[13].mxu1  ;;  %1179 = vst.msk [vmem:[%s1647_s5 + $0x58] sm:$0xff] %vm483_vm2, %v731_v63  ;;  %v1344_v1 = vpop.f32.mrb[19].mxu0 }
 0x1d7   : > { %v637_v2 = vpop.f32.mrb[14].mxu1  ;;  %v889_v3 = vpop.f32.mrb[20].mxu0 }
 0x1d8   : > { %1171 = vst.msk [vmem:[%s1647_s5 + $0x30] sm:$0xff] %vm483_vm2, %v637_v2  ;;  %v1325_v4 = vpop.f32.mrb[15].mxu1  ;;  %1189 = vst.msk [vmem:[%s1647_s5 + $0x78] sm:$0xff] %vm483_vm2, %v889_v3  ;;  %v1364_v5 = vpop.f32.mrb[21].mxu0 }
 0x1db   : > { %v642_v6 = vpop.f32.mrb[16].mxu1  ;;  %v894_v7 = vpop.f32.mrb[22].mxu0 }
 0x1dc   : > { %1172 = vst.msk [vmem:[%s1647_s5 + $0x38] sm:$0xff] %vm483_vm2, %v642_v6  ;;  %v1328_v8 = vpop.f32.mrb[17].mxu1  ;;  %1190 = vst.msk [vmem:[%s1647_s5 + $0x80] sm:$0xff] %vm483_vm2, %v894_v7  ;;  %v1367_v9 = vpop.f32.mrb[23].mxu0 }
 0x1df   : > { %v647_v10 = vpop.f32.mrb[18].mxu1  ;;  %v899_v11 = vpop.f32.mrb[24].mxu0 }
 0x1e0   : > { %1173 = vst.msk [vmem:[%s1647_s5 + $0x40] sm:$0xff] %vm483_vm2, %v647_v10  ;;  %v1331_v12 = vpop.f32.mrb[19].mxu1  ;;  %1191 = vst.msk [vmem:[%s1647_s5 + $0x88] sm:$0xff] %vm483_vm2, %v899_v11  ;;  %v1370_v13 = vpop.f32.mrb[25].mxu0 }
 0x1e3   : > { %v805_v14 = vpop.f32.mrb[20].mxu1  ;;  %v1057_v15 = vpop.f32.mrb[26].mxu0 }
 0x1e4   : > { %1183 = vst.msk [vmem:[%s1647_s5 + $0x60] sm:$0xff] %vm483_vm2, %v805_v14  ;;  %v1351_v16 = vpop.f32.mrb[21].mxu1  ;;  %1201 = vst.msk [vmem:[%s1647_s5 + $0xa8] sm:$0xff] %vm483_vm2, %v1057_v15  ;;  %v1390_v17 = vpop.f32.mrb[27].mxu0 }
 0x1e7   : > { %v810_v18 = vpop.f32.mrb[22].mxu1  ;;  %v1062_v19 = vpop.f32.mrb[28].mxu0 }
 0x1e8   : > { %1184 = vst.msk [vmem:[%s1647_s5 + $0x68] sm:$0xff] %vm483_vm2, %v810_v18  ;;  %v1354_v20 = vpop.f32.mrb[23].mxu1  ;;  %1202 = vst.msk [vmem:[%s1647_s5 + $0xb0] sm:$0xff] %vm483_vm2, %v1062_v19  ;;  %v1393_v21 = vpop.f32.mrb[29].mxu0 }
 0x1eb   : > { %v815_v22 = vpop.f32.mrb[24].mxu1  ;;  %v1067_v23 = vpop.f32.mrb[30].mxu0 }
 0x1ec   : > { %1185 = vst.msk [vmem:[%s1647_s5 + $0x70] sm:$0xff] %vm483_vm2, %v815_v22  ;;  %v1357_v24 = vpop.f32.mrb[25].mxu1  ;;  %1203 = vst.msk [vmem:[%s1647_s5 + $0xb8] sm:$0xff] %vm483_vm2, %v1067_v23  ;;  %v1396_v25 = vpop.f32.mrb[31].mxu0 }
 0x1ef   : > { %v973_v26 = vpop.f32.mrb[26].mxu1 }
 0x1f0   : > { %1195 = vst.msk [vmem:[%s1647_s5 + $0x90] sm:$0xff] %vm483_vm2, %v973_v26  ;;  %v1377_v27 = vpop.f32.mrb[27].mxu1 }
 0x1f3   : > { %v978_v28 = vpop.f32.mrb[28].mxu1 }
 0x1f4   : > { %1196 = vst.msk [vmem:[%s1647_s5 + $0x98] sm:$0xff] %vm483_vm2, %v978_v28  ;;  %v1380_v29 = vpop.f32.mrb[29].mxu1 }
 0x1f7   : > { %v983_v30 = vpop.f32.mrb[30].mxu1 }
 0x1f8   : > { %1197 = vst.msk [vmem:[%s1647_s5 + $0xa0] sm:$0xff] %vm483_vm2, %v983_v30  ;;  %v1383_v31 = vpop.f32.mrb[31].mxu1 }
 0x1f9 PF: > { %s13_s12 = sadd.s32 1, %s1445_s12  }
 0x1fa   : > { %p10_p4 = scmp.ge.s32.totalorder %s13_s12, 8  }
 0x1fc   :  { %12 = sbr.rel (!%p10_p4) target bundleno = 1 (0x1), region = 69 }

</bundles_post_ra>
